<compile_context>
chip_gen: v5e
topology: v5e:2x2
jax: 0.10.0
libtpu: 0.0.40
codegen_flags: <defaults>
</compile_context>

<pallas_src>
import functools

import jax
import jax.numpy as jnp
from jax.experimental import pallas as pl
from jax.experimental.pallas import tpu as pltpu


def _round_up(a, b):
    return (a + b - 1) // b * b


def _linear_kernel(x_ref, w_ref, b_ref, o_ref):
    # x_ref: (tm, K) bf16, w_ref: (K, Npad) bf16, b_ref: (1, Npad) f32,
    # o_ref: (tm, Npad) out dtype.  Single MXU matmul, f32 accumulate, fused bias.
    acc = jnp.dot(x_ref[...], w_ref[...], preferred_element_type=jnp.float32)
    o_ref[...] = (acc + b_ref[...]).astype(o_ref.dtype)


def patch_merging_forward(x, weight, bias, downscaling_factor,
                          *, compute_dtype=jnp.bfloat16):
    """Equivalent of PatchMerging.forward.

    x:      (b, c, h, w)                NCHW, like PyTorch
    weight: (out_channels, c * df**2)   nn.Linear weight layout
    bias:   (out_channels,)
    returns (b, h//df, w//df, out_channels)
    """
    b, c, h, w = x.shape
    df = downscaling_factor
    nh, nw = h // df, w // df
    K = c * df * df
    N = weight.shape[0]
    M = b * nh * nw
    out_dtype = x.dtype

    # ---- unfold layout: nn.Unfold(k=df, s=df) orders features channel-major,
    # then kernel-row, then kernel-col  ->  index = ci*(df*df) + di*df + dj.
    # One fused XLA pass: cast to bf16 + transpose (intermediate is half-size).
    xf = (
        x.astype(compute_dtype)
         .reshape(b, c, nh, df, nw, df)
         .transpose(0, 2, 4, 1, 3, 5)
         .reshape(M, K)
    )

    # ---- lane-dense output: pad N to a multiple of 128 when N is small so the
    # output block stores full 128-wide lanes instead of masked partial stores.
    Npad = _round_up(N, 128) if N < 128 else N
    wt = jnp.transpose(weight).astype(compute_dtype)          # (K, N)
    b2 = bias.astype(jnp.float32).reshape(1, N)               # (1, N), kept f32
    if Npad != N:
        wt = jnp.pad(wt, ((0, 0), (0, Npad - N)))
        b2 = jnp.pad(b2, ((0, 0), (0, Npad - N)))

    in_bytes = jnp.dtype(compute_dtype).itemsize
    out_bytes = jnp.dtype(out_dtype).itemsize

    # ---- tile the token (M) axis: biggest tile that fits a conservative VMEM
    # budget (sized for v7x's 64 MiB physical VMEM).  Count double buffers for
    # the streamed input/output tiles plus the resident weight/bias.
    VMEM_TARGET = 40 * 1024 * 1024
    fixed = 2 * K * Npad * in_bytes + 2 * Npad * 4
    per_row = 2 * K * in_bytes + 2 * Npad * out_bytes
    tm_budget = max(8, min(2048, (VMEM_TARGET - fixed) // per_row))
    tm_budget = (tm_budget // 8) * 8

    if M <= tm_budget:
        if M >= 1024 and M % 8 == 0:
            # split into (at least) two tiles so both v7x TensorCores get work
            tm = _round_up(pl.cdiv(M, 2), 8)
        else:
            tm = M                       # whole axis in one tile (always legal)
    else:
        tm = tm_budget                   # multiple of 8; last tile may be partial
    grid = (pl.cdiv(M, tm),)

    # Scoped-VMEM request: enough for the chosen tiles, >= 32 MiB (raises v5e's
    # 16 MiB default), capped well under v7x's 64 MiB physical VMEM.
    vmem_need = fixed + tm * per_row + (1 << 20)
    vmem_limit = int(min(max(vmem_need, 32 * 1024 * 1024), 48 * 1024 * 1024))

    cost = pl.CostEstimate(
        flops=2 * M * K * Npad,
        transcendentals=0,
        bytes_accessed=M * K * in_bytes + K * Npad * in_bytes + M * Npad * out_bytes,
    )

    out_flat = pl.pallas_call(
        _linear_kernel,
        out_shape=jax.ShapeDtypeStruct((M, Npad), out_dtype),
        grid=grid,
        in_specs=[
            pl.BlockSpec((tm, K), lambda i: (i, 0)),       # streamed row tiles
            pl.BlockSpec((K, Npad), lambda i: (0, 0)),     # resident weight
            pl.BlockSpec((1, Npad), lambda i: (0, 0)),     # resident bias (f32)
        ],
        out_specs=pl.BlockSpec((tm, Npad), lambda i: (i, 0)),
        compiler_params=pltpu.CompilerParams(
            dimension_semantics=("parallel",),             # shards M across TCs on v7x
            vmem_limit_bytes=vmem_limit,
        ),
        cost_estimate=cost,
    )(xf, wt, b2)

    out = out_flat.reshape(b, nh, nw, Npad)
    if Npad != N:
        out = out[..., :N]
    return out


def _reference(x, weight, bias, df):
    """Pure-JAX f32 reference with nn.Unfold's channel-major ordering."""
    b, c, h, w = x.shape
    nh, nw = h // df, w // df
    patches = (
        x.reshape(b, c, nh, df, nw, df)
         .transpose(0, 2, 4, 1, 3, 5)
         .reshape(b, nh, nw, c * df * df)
    )
    return patches @ weight.T + bias


if __name__ == "__main__":
    # Module config: in_channels=4, out_channels=32, downscaling_factor=2
    in_channels, out_channels, df = 4, 32, 2
    b, h, w = 2, 16, 16

    key = jax.random.PRNGKey(0)
    kx, kw, kb = jax.random.split(key, 3)

    x = jax.random.normal(kx, (b, in_channels, h, w), dtype=jnp.float32)
    # nn.Linear(in_channels*df**2, out_channels): weight (out, in), bias (out,)
    weight = jax.random.normal(
        kw, (out_channels, in_channels * df * df), dtype=jnp.float32
    ) * 0.1
    bias = jax.random.normal(kb, (out_channels,), dtype=jnp.float32) * 0.1

    fwd = jax.jit(functools.partial(patch_merging_forward, downscaling_factor=df))
    out = jax.block_until_ready(fwd(x, weight, bias))

    ref = _reference(x, weight, bias, df)
    assert out.shape == (b, h // df, w // df, out_channels), out.shape
    # bf16 MXU inputs with f32 accumulation: allow small numerical slack vs f32 ref.
    err = float(jnp.max(jnp.abs(out - ref)))
    assert jnp.allclose(out, ref, atol=2e-2, rtol=2e-2), f"mismatch vs reference (max abs err {err})"

    print("KERNEL_OK")
</pallas_src>

<mosaic_0001>
module attributes {stable_mosaic.version = 11 : i64} {
  func.func @_linear_kernel(%arg0: i32, %arg1: memref<128x16xbf16, #tpu.memory_space<vmem>>, %arg2: memref<16x128xbf16, #tpu.memory_space<vmem>>, %arg3: memref<1x128xf32, #tpu.memory_space<vmem>>, %arg4: memref<128x128xf32, #tpu.memory_space<vmem>>) attributes {dimension_semantics = [#tpu.dimension_semantics<parallel>], iteration_bounds = array<i64: 1>, scalar_prefetch = 0 : i64, scratch_operands = 0 : i64, tpu.core_type = #tpu.core_type<tc>, window_params = [{transform_indices = @transform_0, window_bounds = array<i64: 128, 16>}, {pipeline_mode = #tpu.pipeline_mode<synchronous>, transform_indices = @transform_1, window_bounds = array<i64: 16, 128>}, {pipeline_mode = #tpu.pipeline_mode<synchronous>, transform_indices = @transform_2, window_bounds = array<i64: 1, 128>}, {transform_indices = @transform_3, window_bounds = array<i64: 128, 128>}]} {
    %c0 = arith.constant 0 : index
    %c0_0 = arith.constant 0 : index
    %0 = vector.load %arg1[%c0, %c0_0] : memref<128x16xbf16, #tpu.memory_space<vmem>>, vector<128x16xbf16>
    %c0_1 = arith.constant 0 : index
    %c0_2 = arith.constant 0 : index
    %1 = vector.load %arg2[%c0_1, %c0_2] : memref<16x128xbf16, #tpu.memory_space<vmem>>, vector<16x128xbf16>
    %cst = arith.constant dense<0.000000e+00> : vector<128x128xf32>
    %2 = tpu.matmul %0, %1, %cst {dimension_numbers = #tpu.dot_dimension_numbers<[1], [0], [0], [1], [0, 0, 1, 1], [], []>} : vector<128x16xbf16>, vector<16x128xbf16>, vector<128x128xf32> -> vector<128x128xf32>
    %c0_3 = arith.constant 0 : index
    %c0_4 = arith.constant 0 : index
    %3 = vector.load %arg3[%c0_3, %c0_4] : memref<1x128xf32, #tpu.memory_space<vmem>>, vector<1x128xf32>
    %4 = vector.broadcast %3 : vector<1x128xf32> to vector<128x128xf32>
    %5 = arith.addf %2, %4 : vector<128x128xf32>
    %c0_5 = arith.constant 0 : index
    %c0_6 = arith.constant 0 : index
    %6 = vector.load %arg4[%c0_5, %c0_6] : memref<128x128xf32, #tpu.memory_space<vmem>>, vector<128x128xf32>
    tpu.vector_store %arg4[%c0_5, %c0_6], %5 {strides = array<i32>} : memref<128x128xf32, #tpu.memory_space<vmem>>, vector<128x128xf32>,
    return
  }
  func.func @transform_0(%arg0: i32) -> (i32, i32) {
    %c0_i32 = arith.constant 0 : i32
    %c0_i32_0 = arith.constant 0 : i32
    return %arg0, %c0_i32 : i32, i32
  }
  func.func @transform_1(%arg0: i32) -> (i32, i32) {
    %c0_i32 = arith.constant 0 : i32
    %c0_i32_0 = arith.constant 0 : i32
    %c0_i32_1 = arith.constant 0 : i32
    return %c0_i32, %c0_i32_0 : i32, i32
  }
  func.func @transform_2(%arg0: i32) -> (i32, i32) {
    %c0_i32 = arith.constant 0 : i32
    %c0_i32_0 = arith.constant 0 : i32
    %c0_i32_1 = arith.constant 0 : i32
    return %c0_i32, %c0_i32_0 : i32, i32
  }
  func.func @transform_3(%arg0: i32) -> (i32, i32) {
    %c0_i32 = arith.constant 0 : i32
    %c0_i32_0 = arith.constant 0 : i32
    return %arg0, %c0_i32 : i32, i32
  }
}

</mosaic_0001>

<bundles_post_ra>
// kernel: patch_merging_forward.1
= control target key start
LH: loop header
LB: loop body
LE: loop exit
PB: predicated region body
PF: predicated region fallthrough
CT: control target
= control target key end

     0   :  { %vm84_vm0 = vcmask 130048   ;;  %s342_s0 = inlined_call_operand.vmem [shape: bf16[128,16], index: 0, kind: input, shape index: {}]   ;;  %s343_s1 = inlined_call_operand.vmem [shape: bf16[16,128], index: 1, kind: input, shape index: {}]   ;;  %s344_s2 = inlined_call_operand.vmem [shape: f32[1,128], index: 2, kind: input, shape index: {}]   ;;  %s345_s3 = inlined_call_operand.hbm [shape: f32[128,128], index: 3, kind: output, shape index: {}]  }
   0x1   :  { %v244_v0 = vld [vmem:[%s343_s1] sm:$0xff]  ;;  %v238_v2 = vld [vmem:[%s342_s0 + $0x10] sm:$0xff] }
   0x2   :  { %v236_v1 = vld [vmem:[%s342_s0] sm:$0xff]  ;;  %116 = vmatpush.bf16.msra.mxu0 %v244_v0  ;;  %245 = vmatpush.bf16.msra.mxu1 %v244_v0  ;;  %v242_v4 = vld [vmem:[%s342_s0 + $0x30] sm:$0xff] }
   0x3   :  { %v240_v3 = vld [vmem:[%s342_s0 + $0x20] sm:$0xff]  ;;  %246 = vmatpush.bf16.msra.mxu2 %v244_v0  ;;  %247 = vmatpush.bf16.msra.mxu3 %v244_v0 }
   0x4   :  { %8 = vsyncpa [#allocation3], 0  ;;  %v237_v5 = vld [vmem:[%s342_s0 + $0x8] sm:$0xff]  ;;  %v239_v6 = vld [vmem:[%s342_s0 + $0x18] sm:$0xff]  ;;  %s180_s6 = sshll.u32 %s345_s3, 4  ;;  %s279_s7 = smov 128   ;;  %s181_s6 = int_to_ptr.hbm [resolvable:$true] %s180_s6 }
   0x5   :  { %228 = vmatmul.msk.bf16.vlgmr.msra.gmra.mxu0 %vm84_vm0, %v236_v1  ;;  %230 = vmatmul.msk.bf16.vlgmr.msra.gmra.mxu1 %vm84_vm0, %v238_v2  ;;  %v241_v7 = vld [vmem:[%s342_s0 + $0x28] sm:$0xff]  ;;  %v243_v8 = vld [vmem:[%s342_s0 + $0x38] sm:$0xff]  ;;  %v251_v9 = vld [vmem:[%s344_s2] ss:$0 sm:$0xff]  ;;  %s278_s0 = smov [#allocation2]   ;;  %s280_s8 = smov 8  }
   0x6   :  { %232 = vmatmul.msk.bf16.vlgmr.msra.gmra.mxu2 %vm84_vm0, %v240_v3  ;;  %234 = vmatmul.msk.bf16.vlgmr.msra.gmra.mxu3 %vm84_vm0, %v242_v4  ;;  %s178_s2 = sshll.u32 %s278_s0, 4  ;;  %s179_s2 = int_to_ptr.vmem [resolvable:$true] %s178_s2 }
  0x15   :  { %229 = vmatmul.msk.bf16.gmra.mxu0 %vm84_vm0, %v237_v5  ;;  %231 = vmatmul.msk.bf16.gmra.mxu1 %vm84_vm0, %v239_v6 }
  0x16   :  { %233 = vmatmul.msk.bf16.gmra.mxu2 %vm84_vm0, %v241_v7  ;;  %235 = vmatmul.msk.bf16.gmra.mxu3 %vm84_vm0, %v243_v8 }
  0x82   :  { %v118_v10 = vpop.f32.mrf.mxu0  ;;  %v128_v11 = vpop.f32.mrf.mxu1 }
  0x83   :  { %v119_v12 = vadd.f32 %v251_v9, %v118_v10  ;;  %v129_v13 = vadd.f32 %v251_v9, %v128_v11 }
  0x85   :  { %158 = vst [vmem:[#allocation2] sm:$0xff] %v119_v12 }
  0x86   :  { %162 = vst [vmem:[#allocation2 + $0x20] sm:$0xff] %v129_v13 }
  0x89   :  { %v138_v14 = vpop.f32.mrf.mxu2  ;;  %v148_v15 = vpop.f32.mrf.mxu3 }
  0x8a   :  { %v139_v16 = vadd.f32 %v251_v9, %v138_v14  ;;  %v149_v17 = vadd.f32 %v251_v9, %v148_v15  ;;  %v120_v18 = vpop.f32.mrf.mxu0  ;;  %v130_v19 = vpop.f32.mrf.mxu1 }
  0x8b   :  { %v121_v20 = vadd.f32 %v251_v9, %v120_v18  ;;  %v131_v21 = vadd.f32 %v251_v9, %v130_v19 }
  0x8c   :  { %166 = vst [vmem:[#allocation2 + $0x40] sm:$0xff] %v139_v16 }
  0x8d   :  { %170 = vst [vmem:[#allocation2 + $0x60] sm:$0xff] %v149_v17 }
  0x8e   :  { %159 = vst [vmem:[#allocation2 + $0x8] sm:$0xff] %v121_v20 }
  0x8f   :  { %163 = vst [vmem:[#allocation2 + $0x28] sm:$0xff] %v131_v21 }
  0x91   :  { %v140_v22 = vpop.f32.mrf.mxu2  ;;  %v150_v23 = vpop.f32.mrf.mxu3 }
  0x92   :  { %v141_v24 = vadd.f32 %v251_v9, %v140_v22  ;;  %v151_v25 = vadd.f32 %v251_v9, %v150_v23  ;;  %v123_v26 = vpop.f32.mrf.mxu0  ;;  %v133_v27 = vpop.f32.mrf.mxu1 }
  0x93   :  { %v124_v28 = vadd.f32 %v251_v9, %v123_v26  ;;  %v134_v29 = vadd.f32 %v251_v9, %v133_v27 }
  0x94   :  { %167 = vst [vmem:[#allocation2 + $0x48] sm:$0xff] %v141_v24 }
  0x95   :  { %171 = vst [vmem:[#allocation2 + $0x68] sm:$0xff] %v151_v25 }
  0x96   :  { %160 = vst [vmem:[#allocation2 + $0x10] sm:$0xff] %v124_v28 }
  0x97   :  { %164 = vst [vmem:[#allocation2 + $0x30] sm:$0xff] %v134_v29 }
  0x99   :  { %v143_v30 = vpop.f32.mrf.mxu2  ;;  %v153_v31 = vpop.f32.mrf.mxu3 }
  0x9a   :  { %v144_v32 = vadd.f32 %v251_v9, %v143_v30  ;;  %v154_v33 = vadd.f32 %v251_v9, %v153_v31  ;;  %v125_v34 = vpop.f32.mrf.mxu0  ;;  %v135_v35 = vpop.f32.mrf.mxu1 }
  0x9b   :  { %v126_v36 = vadd.f32 %v251_v9, %v125_v34  ;;  %v136_v37 = vadd.f32 %v251_v9, %v135_v35 }
  0x9c   :  { %168 = vst [vmem:[#allocation2 + $0x50] sm:$0xff] %v144_v32 }
  0x9d   :  { %172 = vst [vmem:[#allocation2 + $0x70] sm:$0xff] %v154_v33 }
  0x9e   :  { %161 = vst [vmem:[#allocation2 + $0x18] sm:$0xff] %v126_v36 }
  0x9f   :  { %165 = vst [vmem:[#allocation2 + $0x38] sm:$0xff] %v136_v37 }
  0xa1   :  { %v145_v38 = vpop.f32.mrf.mxu2  ;;  %v155_v39 = vpop.f32.mrf.mxu3 }
  0xa2   :  { %v146_v40 = vadd.f32 %v251_v9, %v145_v38  ;;  %v156_v41 = vadd.f32 %v251_v9, %v155_v39 }
  0xa4   :  { %169 = vst [vmem:[#allocation2 + $0x58] sm:$0xff] %v146_v40 }
  0xa5   :  { %173 = vst [vmem:[#allocation2 + $0x78] sm:$0xff] %v156_v41 }
  0xa6   :  { %186 = dma.vmem_to_hbm [thread:$0]  %s179_s2, 2048, %s181_s6, [#allocation3], %s279_s7, %s279_s7, %s280_s8  }
  0xa7   :  { %276 = dma.done.wait [#allocation3], 2048  }
  0xa8   :  { %277 = vsyncadd [#allocation3], 4294965248 }
  0xa9   :  { %191 = vsyncpa [#allocation3], 1 }

</bundles_post_ra>
